<compile_context>
chip_gen: v7x
topology: tpu7x:2x2x1
jax: 0.10.0
libtpu: 0.0.40
codegen_flags: <defaults>
</compile_context>

<pallas_src>
import functools

import jax
import jax.numpy as jnp
from jax.experimental import pallas as pl
from jax.experimental.pallas import tpu as pltpu


def _weighted_dice_kernel(logit_ref, truth_ref, out_ref,
                          acc_pt, acc_pp, acc_tt,
                          *, w0: float, w1: float, smooth: float,
                          inv_batch: float):
    # logit_ref / truth_ref: (B, TD) tile of the flattened (B, D) inputs
    # out_ref:               (1, 1)  final scalar loss (written on last step)
    # acc_*:                 (B, 1)  per-batch partial sums, carried over grid
    k = pl.program_id(0)

    @pl.when(k == 0)
    def _():
        acc_pt[...] = jnp.zeros_like(acc_pt)
        acc_pp[...] = jnp.zeros_like(acc_pp)
        acc_tt[...] = jnp.zeros_like(acc_tt)

    p = logit_ref[...]
    t = truth_ref[...]

    # w = t*(w1-w0)+w0 ; p' = w*p ; t' = w*t.  All three sums share w^2, and
    # two of them share w^2*p, so compute those factors once.
    w = t * (w1 - w0) + w0
    w2 = w * w
    w2p = w2 * p

    acc_pt[...] += jnp.sum(w2p * t, axis=-1, keepdims=True)   # sum(p'*t')
    acc_pp[...] += jnp.sum(w2p * p, axis=-1, keepdims=True)   # sum(p'*p')
    acc_tt[...] += jnp.sum(w2 * t * t, axis=-1, keepdims=True)  # sum(t'*t')

    @pl.when(k == pl.num_programs(0) - 1)
    def _():
        inter = acc_pt[...]
        union = acc_pp[...] + acc_tt[...]
        dice = 1.0 - (2.0 * inter + smooth) / (union + smooth)   # (B, 1)
        out_ref[...] = jnp.sum(dice, axis=0, keepdims=True) * inv_batch


def weighted_dice_loss(logit, truth, weights=(0.5, 0.5), smooth=1e-5,
                       block_d=512):
    """Pallas implementation of WeightedDiceLoss.forward(logit, truth)."""
    batch = logit.shape[0]
    p = logit.reshape(batch, -1).astype(jnp.float32)
    t = truth.reshape(batch, -1).astype(jnp.float32)
    assert p.shape == t.shape
    d = p.shape[1]

    # Lane-dense block along the flattened feature axis; pad D so blocks divide
    # evenly.  Zero padding is exact: p = t = 0 there, so w^2*p*t, w^2*p*p and
    # w^2*t*t are all zero regardless of the weights.
    td = min(block_d, max(128, pl.next_power_of_2(d)))
    num_blocks = pl.cdiv(d, td)
    d_pad = num_blocks * td
    if d_pad != d:
        pad = d_pad - d
        p = jnp.pad(p, ((0, 0), (0, pad)))
        t = jnp.pad(t, ((0, 0), (0, pad)))

    kernel = functools.partial(
        _weighted_dice_kernel,
        w0=float(weights[0]), w1=float(weights[1]),
        smooth=float(smooth), inv_batch=1.0 / batch)

    out = pl.pallas_call(
        kernel,
        out_shape=jax.ShapeDtypeStruct((1, 1), jnp.float32),
        grid_spec=pltpu.PrefetchScalarGridSpec(
            num_scalar_prefetch=0,
            grid=(num_blocks,),
            in_specs=[pl.BlockSpec((batch, td), lambda k: (0, k)),
                      pl.BlockSpec((batch, td), lambda k: (0, k))],
            out_specs=pl.BlockSpec((1, 1), lambda k: (0, 0)),
            scratch_shapes=[pltpu.VMEM((batch, 1), jnp.float32)] * 3),
        compiler_params=pltpu.CompilerParams(
            dimension_semantics=("arbitrary",)),
    )(p, t)

    return out[0, 0]


def _reference(logit, truth, weights=(0.5, 0.5), smooth=1e-5):
    b = logit.shape[0]
    p = logit.reshape(b, -1).astype(jnp.float32)
    t = truth.reshape(b, -1).astype(jnp.float32)
    w = t * (weights[1] - weights[0]) + weights[0]
    p = w * p
    t = w * t
    inter = (p * t).sum(-1)
    union = (p * p).sum(-1) + (t * t).sum(-1)
    dice = 1.0 - (2.0 * inter + smooth) / (union + smooth)
    return dice.mean()


if __name__ == "__main__":
    key = jax.random.PRNGKey(0)
    k_logit, k_truth = jax.random.split(key)

    # Shapes consistent with the module's typical use: (B, C, H, W) masks.
    B, C, H, W = 2, 4, 16, 16
    logit = jax.nn.sigmoid(
        jax.random.normal(k_logit, (B, C, H, W), dtype=jnp.float32))
    truth = (jax.random.uniform(k_truth, (B, C, H, W)) > 0.5).astype(
        jnp.float32)

    # Default module weights [0.5, 0.5].
    out = jax.block_until_ready(weighted_dice_loss(logit, truth))
    ref = _reference(logit, truth)
    assert jnp.allclose(out, ref, atol=1e-5, rtol=1e-5), (
        float(out), float(ref))

    # Non-trivial weights exercise the w = t*(w1-w0)+w0 path.
    out2 = jax.block_until_ready(
        weighted_dice_loss(logit, truth, weights=(0.2, 0.8)))
    ref2 = _reference(logit, truth, weights=(0.2, 0.8))
    assert jnp.allclose(out2, ref2, atol=1e-5, rtol=1e-5), (
        float(out2), float(ref2))

    print("KERNEL_OK")
</pallas_src>

<mosaic_0001>
module attributes {stable_mosaic.version = 11 : i64} {
  func.func @_weighted_dice_kernel(%arg0: i32, %arg1: memref<2x512xf32, #tpu.memory_space<vmem>>, %arg2: memref<2x512xf32, #tpu.memory_space<vmem>>, %arg3: memref<1x1xf32, #tpu.memory_space<vmem>>, %arg4: memref<2x1xf32, #tpu.memory_space<vmem>>, %arg5: memref<2x1xf32, #tpu.memory_space<vmem>>, %arg6: memref<2x1xf32, #tpu.memory_space<vmem>>) attributes {dimension_semantics = [#tpu.dimension_semantics<arbitrary>], iteration_bounds = array<i64: 2>, scalar_prefetch = 0 : i64, scratch_operands = 3 : i64, tpu.core_type = #tpu.core_type<tc>, window_params = [{transform_indices = @transform_0, window_bounds = array<i64: 2, 512>}, {transform_indices = @transform_1, window_bounds = array<i64: 2, 512>}, {pipeline_mode = #tpu.pipeline_mode<synchronous>, transform_indices = @transform_2, window_bounds = array<i64: 1, 1>}]} {
    %c0_i32 = arith.constant 0 : i32
    %0 = arith.cmpi eq, %arg0, %c0_i32 : i32
    %1 = arith.extui %0 : i1 to i32
    %c0_i32_0 = arith.constant 0 : i32
    %2 = arith.cmpi ne, %1, %c0_i32_0 : i32
    scf.if %2 {
      %cst_21 = arith.constant 0.000000e+00 : f32
      %33 = vector.broadcast %cst_21 : f32 to vector<2x1xf32>
      %c0_22 = arith.constant 0 : index
      %c0_23 = arith.constant 0 : index
      %34 = vector.load %arg4[%c0_22, %c0_23] : memref<2x1xf32, #tpu.memory_space<vmem>>, vector<2x1xf32>
      tpu.vector_store %arg4[%c0_22, %c0_23], %33 {strides = array<i32>} : memref<2x1xf32, #tpu.memory_space<vmem>>, vector<2x1xf32>,
      %cst_24 = arith.constant 0.000000e+00 : f32
      %35 = vector.broadcast %cst_24 : f32 to vector<2x1xf32>
      %c0_25 = arith.constant 0 : index
      %c0_26 = arith.constant 0 : index
      %36 = vector.load %arg5[%c0_25, %c0_26] : memref<2x1xf32, #tpu.memory_space<vmem>>, vector<2x1xf32>
      tpu.vector_store %arg5[%c0_25, %c0_26], %35 {strides = array<i32>} : memref<2x1xf32, #tpu.memory_space<vmem>>, vector<2x1xf32>,
      %cst_27 = arith.constant 0.000000e+00 : f32
      %37 = vector.broadcast %cst_27 : f32 to vector<2x1xf32>
      %c0_28 = arith.constant 0 : index
      %c0_29 = arith.constant 0 : index
      %38 = vector.load %arg6[%c0_28, %c0_29] : memref<2x1xf32, #tpu.memory_space<vmem>>, vector<2x1xf32>
      tpu.vector_store %arg6[%c0_28, %c0_29], %37 {strides = array<i32>} : memref<2x1xf32, #tpu.memory_space<vmem>>, vector<2x1xf32>,
    } else {
    }
    %c0 = arith.constant 0 : index
    %c0_1 = arith.constant 0 : index
    %3 = vector.load %arg1[%c0, %c0_1] : memref<2x512xf32, #tpu.memory_space<vmem>>, vector<2x512xf32>
    %c0_2 = arith.constant 0 : index
    %c0_3 = arith.constant 0 : index
    %4 = vector.load %arg2[%c0_2, %c0_3] : memref<2x512xf32, #tpu.memory_space<vmem>>, vector<2x512xf32>
    %cst = arith.constant 0.000000e+00 : f32
    %5 = vector.broadcast %cst : f32 to vector<2x512xf32>
    %6 = arith.mulf %4, %5 : vector<2x512xf32>
    %cst_4 = arith.constant 5.000000e-01 : f32
    %7 = vector.broadcast %cst_4 : f32 to vector<2x512xf32>
    %8 = arith.addf %6, %7 : vector<2x512xf32>
    %9 = arith.mulf %8, %8 : vector<2x512xf32>
    %10 = arith.mulf %9, %3 : vector<2x512xf32>
    %c0_5 = arith.constant 0 : index
    %c0_6 = arith.constant 0 : index
    %11 = vector.load %arg4[%c0_5, %c0_6] : memref<2x1xf32, #tpu.memory_space<vmem>>, vector<2x1xf32>
    %12 = arith.mulf %10, %4 : vector<2x512xf32>
    %cst_7 = arith.constant dense<0.000000e+00> : vector<2xf32>
    %13 = vector.multi_reduction <add>, %12, %cst_7 [1] : vector<2x512xf32> to vector<2xf32>
    %14 = vector.shape_cast %13 : vector<2xf32> to vector<2x1xf32>
    %15 = arith.addf %11, %14 : vector<2x1xf32>
    %c0_8 = arith.constant 0 : index
    %c0_9 = arith.constant 0 : index
    %16 = vector.load %arg4[%c0_8, %c0_9] : memref<2x1xf32, #tpu.memory_space<vmem>>, vector<2x1xf32>
    tpu.vector_store %arg4[%c0_8, %c0_9], %15 {strides = array<i32>} : memref<2x1xf32, #tpu.memory_space<vmem>>, vector<2x1xf32>,
    %c0_10 = arith.constant 0 : index
    %c0_11 = arith.constant 0 : index
    %17 = vector.load %arg5[%c0_10, %c0_11] : memref<2x1xf32, #tpu.memory_space<vmem>>, vector<2x1xf32>
    %18 = arith.mulf %10, %3 : vector<2x512xf32>
    %cst_12 = arith.constant dense<0.000000e+00> : vector<2xf32>
    %19 = vector.multi_reduction <add>, %18, %cst_12 [1] : vector<2x512xf32> to vector<2xf32>
    %20 = vector.shape_cast %19 : vector<2xf32> to vector<2x1xf32>
    %21 = arith.addf %17, %20 : vector<2x1xf32>
    %c0_13 = arith.constant 0 : index
    %c0_14 = arith.constant 0 : index
    %22 = vector.load %arg5[%c0_13, %c0_14] : memref<2x1xf32, #tpu.memory_space<vmem>>, vector<2x1xf32>
    tpu.vector_store %arg5[%c0_13, %c0_14], %21 {strides = array<i32>} : memref<2x1xf32, #tpu.memory_space<vmem>>, vector<2x1xf32>,
    %c0_15 = arith.constant 0 : index
    %c0_16 = arith.constant 0 : index
    %23 = vector.load %arg6[%c0_15, %c0_16] : memref<2x1xf32, #tpu.memory_space<vmem>>, vector<2x1xf32>
    %24 = arith.mulf %9, %4 : vector<2x512xf32>
    %25 = arith.mulf %24, %4 : vector<2x512xf32>
    %cst_17 = arith.constant dense<0.000000e+00> : vector<2xf32>
    %26 = vector.multi_reduction <add>, %25, %cst_17 [1] : vector<2x512xf32> to vector<2xf32>
    %27 = vector.shape_cast %26 : vector<2xf32> to vector<2x1xf32>
    %28 = arith.addf %23, %27 : vector<2x1xf32>
    %c0_18 = arith.constant 0 : index
    %c0_19 = arith.constant 0 : index
    %29 = vector.load %arg6[%c0_18, %c0_19] : memref<2x1xf32, #tpu.memory_space<vmem>>, vector<2x1xf32>
    tpu.vector_store %arg6[%c0_18, %c0_19], %28 {strides = array<i32>} : memref<2x1xf32, #tpu.memory_space<vmem>>, vector<2x1xf32>,
    %c1_i32 = arith.constant 1 : i32
    %30 = arith.cmpi eq, %arg0, %c1_i32 : i32
    %31 = arith.extui %30 : i1 to i32
    %c0_i32_20 = arith.constant 0 : i32
    %32 = arith.cmpi ne, %31, %c0_i32_20 : i32
    scf.if %32 {
      %c0_21 = arith.constant 0 : index
      %c0_22 = arith.constant 0 : index
      %33 = vector.load %arg4[%c0_21, %c0_22] : memref<2x1xf32, #tpu.memory_space<vmem>>, vector<2x1xf32>
      %c0_23 = arith.constant 0 : index
      %c0_24 = arith.constant 0 : index
      %34 = vector.load %arg5[%c0_23, %c0_24] : memref<2x1xf32, #tpu.memory_space<vmem>>, vector<2x1xf32>
      %c0_25 = arith.constant 0 : index
      %c0_26 = arith.constant 0 : index
      %35 = vector.load %arg6[%c0_25, %c0_26] : memref<2x1xf32, #tpu.memory_space<vmem>>, vector<2x1xf32>
      %36 = arith.addf %34, %35 : vector<2x1xf32>
      %cst_27 = arith.constant 2.000000e+00 : f32
      %37 = vector.broadcast %cst_27 : f32 to vector<2x1xf32>
      %38 = arith.mulf %37, %33 : vector<2x1xf32>
      %cst_28 = arith.constant 9.99999974E-6 : f32
      %39 = vector.broadcast %cst_28 : f32 to vector<2x1xf32>
      %40 = arith.addf %38, %39 : vector<2x1xf32>
      %cst_29 = arith.constant 9.99999974E-6 : f32
      %41 = vector.broadcast %cst_29 : f32 to vector<2x1xf32>
      %42 = arith.addf %36, %41 : vector<2x1xf32>
      %43 = arith.divf %40, %42 : vector<2x1xf32>
      %cst_30 = arith.constant 1.000000e+00 : f32
      %44 = vector.broadcast %cst_30 : f32 to vector<2x1xf32>
      %45 = arith.subf %44, %43 : vector<2x1xf32>
      %cst_31 = arith.constant dense<0.000000e+00> : vector<1xf32>
      %46 = vector.multi_reduction <add>, %45, %cst_31 [0] : vector<2x1xf32> to vector<1xf32>
      %47 = vector.shape_cast %46 : vector<1xf32> to vector<1x1xf32>
      %cst_32 = arith.constant 5.000000e-01 : f32
      %48 = vector.broadcast %cst_32 : f32 to vector<1x1xf32>
      %49 = arith.mulf %47, %48 : vector<1x1xf32>
      %c0_33 = arith.constant 0 : index
      %c0_34 = arith.constant 0 : index
      %50 = vector.load %arg3[%c0_33, %c0_34] : memref<1x1xf32, #tpu.memory_space<vmem>>, vector<1x1xf32>
      tpu.vector_store %arg3[%c0_33, %c0_34], %49 {strides = array<i32>} : memref<1x1xf32, #tpu.memory_space<vmem>>, vector<1x1xf32>,
    } else {
    }
    return
  }
  func.func @transform_0(%arg0: i32) -> (i32, i32) {
    %c0_i32 = arith.constant 0 : i32
    %c0_i32_0 = arith.constant 0 : i32
    return %c0_i32, %arg0 : i32, i32
  }
  func.func @transform_1(%arg0: i32) -> (i32, i32) {
    %c0_i32 = arith.constant 0 : i32
    %c0_i32_0 = arith.constant 0 : i32
    return %c0_i32, %arg0 : i32, i32
  }
  func.func @transform_2(%arg0: i32) -> (i32, i32) {
    %c0_i32 = arith.constant 0 : i32
    %c0_i32_0 = arith.constant 0 : i32
    %c0_i32_1 = arith.constant 0 : i32
    return %c0_i32, %c0_i32_0 : i32, i32
  }
}

</mosaic_0001>

<bundles_post_ra>
// kernel: tpu_custom_call.1
= control target key start
LH: loop header
LB: loop body
LE: loop exit
PB: predicated region body
PF: predicated region fallthrough
CT: control target
= control target key end

     0   :  { %7 = vsyncpa [#allocation6], 0  ;;  %s829_s0 = inlined_call_operand.hbm [shape: f32[2,1024], index: 0, kind: input, shape index: {}]   ;;  %s830_s1 = inlined_call_operand.hbm [shape: f32[2,1024], index: 1, kind: input, shape index: {}]   ;;  %s831_s2 = inlined_call_operand.hbm [shape: f32[1,1], index: 2, kind: output, shape index: {}]  }
   0x1   :  { %9 = vsyncpa [#allocation6 + $0x1], 0 }
   0x2   :  { %10 = vsyncpa [#allocation9], 0 }
   0x3   :  { %12 = vsyncpa [#allocation9 + $0x1], 0 }
   0x4   :  { %13 = vsyncpa [#allocation7], 0  ;;  %s639_s9 = smov 0   ;;  %s641_s10 = smov 0  }
   0x5   :  { %s643_s11 = smov 0   ;;  %s645_s12 = smov 0  }
   0x6 LB: > { %s658_s13 = sadd.s32 4294967295, %s617_s12   ;;  %s661_s14 = sadd.s32 1, %s617_s12   ;;  %s617_s12 = sphi %s645_s12, %s843_s12   ;;  %s613_s11 = sphi %s643_s11, %s842_s11   ;;  %s609_s10 = sphi %s641_s10, %s841_s10   ;;  %s605_s9 = sphi %s639_s9, %s840_s9  }
   0x7   : > { %s23_s15 = ssub.s32 %s617_s12, %s661_s14  ;;  %s26_s16 = sadd.s32 1, %s613_s11 }
   0x8   : > { %p24_p0 = scmp.eq.s32.totalorder %s23_s15, 0  ;;  %p33_p1 = scmp.ne.s32.totalorder %s613_s11, %s609_s10 }
   0x9   : > { %p34_p2 = scmp.eq.s32.totalorder %s617_s12, 0  ;;  %p39_p3 = scmp.ne.s32.totalorder %s609_s10, %s605_s9 }
   0xa   : > { %s671_s17 = scalar_select %p24_p0, %s613_s11, %s26_s16  }
   0xb   : > { %p35_p4 = por %p34_p2, %p33_p1  ;;  %p40_p5 = scmp.eq.s32.totalorder %s658_s13, 0 }
   0xc   : > { %p449_p6 = scmp.lt.s32.totalorder %s617_s12, 2  ;;  %s680_s19 = sand.u32 1, %s613_s11  }
   0xd   : > { %p675_p7 = por %p40_p5, %p39_p3  ;;  %s417_s20 = sshll.u32 %s680_s19, 3 }
   0xe   : > { %s432_s21 = sshll.u32 %s617_s12, 7  ;;  %s114_s25 = scalar_lea.vmem [#allocation5], %s417_s20 }
   0xf   : > { %s833_s18 = scalar_select %p675_p7, 1, 0 }
  0x10   : > { %s689_s24 = scalar_lea.hbm %s829_s0, %s432_s21  ;;  %s122_s26 = sshll.u32 %s114_s25, 4  ;;  %s693_s26 = int_to_ptr.vmem [resolvable:$true] %s122_s26 }
  0x11   : > { %p695_p8 = pnand %p449_p6, %p35_p4  ;;  %s111_s28 = scalar_lea.sflag [#allocation6], %s680_s19 }
  0x12   : > { %s489_s29 = scalar_lea.hbm %s689_s24, 128  ;;  %s494_s4 = scalar_lea.hbm %s829_s0, 256 }
  0x13   : > { %p490_p11 = scmp.ne.s32.totalorder %s689_s24, %s489_s29  ;;  %p491_p12 = pneg %p695_p8 }
  0x14   : > { %p495_p1 = scmp.lt.u32.totalorder %s689_s24, %s829_s0  ;;  %p496_p2 = scmp.lt.u32.totalorder %s494_s4, %s489_s29 }
  0x15   : > { %p492_p13 = pnand %p491_p12, %p490_p11  ;;  %p498_p4 = scmp.lt.u32.totalorder %s489_s29, %s689_s24 }
  0x16   : > { %p497_p3 = por %p496_p2, %p495_p1 }
  0x17   : > { %p493_p0 = pneg %p492_p13 }
  0x18   : > { %p499_p5 = por %p498_p4, %p497_p3 }
  0x1a   : > { %p500_p6 = pnand %p499_p5, %p493_p0 }
  0x1c   : > { %503 = shalt.err (!%p500_p6)
}
  0x1d   : > { %s504_s7 = scalar_lea.vmem %s693_s26, 128  ;;  %s619_s8 = smov [#allocation5]  }
  0x1e   : > { %p505_p11 = scmp.ne.s32.totalorder %s693_s26, %s504_s7  ;;  %s509_s9 = sshll.u32 %s619_s8, 4  ;;  %s510_s9 = int_to_ptr.vmem [resolvable:$false] %s509_s9 }
  0x1f   : > { %s511_s15 = scalar_lea.vmem %s510_s9, 256  ;;  %p512_p10 = scmp.lt.s32.totalorder %s693_s26, %s510_s9 }
  0x20   : > { %p507_p13 = pnand %p505_p11, %p491_p12  ;;  %p513_p1 = scmp.lt.s32.totalorder %s511_s15, %s504_s7 }
  0x22   : > { %p508_p9 = pneg %p507_p13  ;;  %p514_p2 = por %p513_p1, %p512_p10 }
  0x24   : > { %p515_p3 = pnand %p514_p2, %p508_p9 }
  0x26   : > { %518 = shalt.err (!%p515_p3)
}
  0x27   : > { %445 = dma.hbm_to_vmem [thread:$0]  (!%p695_p8), %s689_s24, 128, %s693_s26, %s111_s28  }
  0x28   : > { %p835_p0 = scmp.lt.s32.totalorder %s617_s12, 3  ;;  %p836_p4 = scmp.ge.s32.totalorder %s617_s12, 1 }
  0x29   : > { %s740_s25 = scalar_lea.hbm %s830_s1, %s432_s21  ;;  %s133_s29 = scalar_lea.vmem [#allocation8], %s417_s20 }
  0x2a   : > { %p731_p5 = pnand %p836_p4, %p835_p0  ;;  %s141_s30 = sshll.u32 %s133_s29, 4  ;;  %s142_s30 = int_to_ptr.vmem [resolvable:$true] %s141_s30 }
  0x2b   : > { %s130_s24 = scalar_lea.sflag [#allocation9], %s680_s19  ;;  %s519_s26 = scalar_lea.hbm %s740_s25, 128 }
  0x2c   : > { %s837_s16 = scalar_select %p731_p5, 1, 0 }
  0x2d   : > { %p520_p9 = scmp.ne.s32.totalorder %s740_s25, %s519_s26  ;;  %s524_s21 = scalar_lea.hbm %s830_s1, 256 }
  0x2e   : > { %p525_p11 = scmp.lt.u32.totalorder %s740_s25, %s830_s1  ;;  %p526_p13 = scmp.lt.u32.totalorder %s524_s21, %s519_s26 }
  0x2f   : > { %p522_p10 = pnand %p520_p9, %p491_p12  ;;  %p528_p2 = scmp.lt.u32.totalorder %s519_s26, %s740_s25 }
  0x30   : > { %p527_p1 = por %p526_p13, %p525_p11 }
  0x31   : > { %p523_p6 = pneg %p522_p10 }
  0x32   : > { %p529_p3 = por %p528_p2, %p527_p1 }
  0x34   : > { %p530_p0 = pnand %p529_p3, %p523_p6 }
  0x36   : > { %533 = shalt.err (!%p530_p0)
}
  0x37   : > { %s534_s19 = scalar_lea.vmem %s142_s30, 128  ;;  %s620_s20 = smov [#allocation8]  }
  0x38   : > { %p535_p4 = scmp.ne.s32.totalorder %s142_s30, %s534_s19  ;;  %s539_s5 = sshll.u32 %s620_s20, 4  ;;  %s540_s5 = int_to_ptr.vmem [resolvable:$false] %s539_s5 }
  0x39   : > { %s541_s6 = scalar_lea.vmem %s540_s5, 256  ;;  %p542_p7 = scmp.lt.s32.totalorder %s142_s30, %s540_s5 }
  0x3a   : > { %p537_p9 = pnand %p535_p4, %p491_p12  ;;  %p543_p5 = scmp.lt.s32.totalorder %s541_s6, %s534_s19 }
  0x3c   : > { %p538_p10 = pneg %p537_p9  ;;  %p544_p11 = por %p543_p5, %p542_p7 }
  0x3e   : > { %p545_p13 = pnand %p544_p11, %p538_p10 }
  0x40   : > { %548 = shalt.err (!%p545_p13)
}
  0x41   : > { %448 = dma.hbm_to_vmem [thread:$0]  (!%p695_p8), %s740_s25, 128, %s142_s30, %s130_s24  }
  0x42   : > { %p838_p6 = scmp.ne.s32.totalorder %s837_s16, 0 }
  0x43   : > { %s152_s7 = sand.u32 (!%p838_p6), 1, %s609_s10   ;;  %p839_p12 = scmp.ne.s32.totalorder (!%p838_p6), %s833_s18, 0 }
  0x44   : > { %150 = sbr.rel (%p838_p6) target bundleno = 325 (0x145), region = 28  ;;  %s424_s8 = sshll.u32 (!%p838_p6), %s152_s7, 3 }
  0x45   : > { %s153_s9 = scalar_lea.sflag (!%p838_p6), [#allocation6], %s152_s7  ;;  %s156_s15 = scalar_lea.vmem (!%p838_p6), [#allocation5], %s424_s8 }
  0x4b   : > { %592 = dma.done.wait (%p839_p12), %s153_s9, 128  }
  0x4c   : > { %594 = vsyncadd (%p839_p12), %s153_s9, 4294967168  ;;  %s162_s22 = scalar_lea.sflag [#allocation9], %s152_s7  ;;  %s165_s23 = scalar_lea.vmem [#allocation8], %s424_s8 }
  0x4d   : > { %596 = dma.done.wait (%p839_p12), %s162_s22, 128  }
  0x4e   : > { %598 = vsyncadd (%p839_p12), %s162_s22, 4294967168  ;;  %p426_p7 = scmp.ne.s32.totalorder %s658_s13, 0 }
  0x4f   : > { %vm192_vm0 = vcmask (!%p426_p7), 1024   ;;  %v621_v0 = vmov (!%p426_p7), 0.0  }
  0x50   : > { %191 = sbr.rel (%p426_p7) target bundleno = 87 (0x57), region = 40  ;;  %193 = vst.msk [vmem:[#allocation2] sm:$0x3] (!%p426_p7), %vm192_vm0, %v621_v0  ;;  %194 = vst.msk [vmem:[#allocation3] sm:$0x3] (!%p426_p7), %vm192_vm0, %v621_v0 }
  0x51   : > { %195 = vst.msk [vmem:[#allocation4] sm:$0x3] (!%p426_p7), %vm192_vm0, %v621_v0 }
  0x57 PF: > { %v197_v1 = vld [vmem:[%s165_s23] sm:$0xff]  ;;  %v209_v2 = vlaneseq  ;;  %v622_v4 = vmov 1983009808   ;;  %v196_v9 = vld [vmem:[%s156_s15] sm:$0xff]  ;;  %vm226_vm1 = vcmask 1041408   ;;  %vm237_vm2 = vcmask 1024  }
  0x58   : > { %v198_v3 = vmul.f32 0.0, %v197_v1  ;;  %v207_v5 = vunpack.c.l.s4 %v622_v4  ;;  %v202_v53 = vld [vmem:[#allocation2] sm:$0x3]  ;;  %v274_v54 = vld [vmem:[#allocation4] sm:$0x3]  ;;  %p427_p8 = scmp.ne.s32.totalorder %s658_s13, 1 }
  0x59   : > { %v210_v8 = vshrl.u32 %v209_v2, 7  ;;  %v239_v59 = vld [vmem:[#allocation3] sm:$0x3]  ;;  %vm332_vm3 = vcmask (!%p427_p8), 0  }
  0x5a   : > { %v199_v6 = vadd.f32 0.5, %v198_v3  ;;  %v208_v7 = vunpack.c.0.s8 %v207_v5 }
  0x5c   : > { %v200_v10 = vmul.f32 %v199_v6, %v199_v6  ;;  %v211_v12 = vsub.s32 %v208_v7, %v210_v8 }
  0x5e   : > { %v201_v11 = vmul.f32 %v200_v10, %v196_v9  ;;  %v275_v13 = vmul.f32 %v200_v10, %v197_v1 }
  0x60   : > { %v203_v14 = vmul.f32 %v201_v11, %v197_v1  ;;  %v276_v15 = vmul.f32 %v275_v13, %v197_v1  ;;  %v240_v16 = vmul.f32 %v201_v11, %v196_v9 }
  0x62   : > { %v205_v17 = vcombine.high %v203_v14, %v203_v14  ;;  %v212_v18 = vrot.slane %v203_v14, %v211_v12  ;;  %v278_v19 = vcombine.high %v276_v15, %v276_v15  ;;  %v285_v20 = vrot.slane %v276_v15, %v211_v12 }
  0x63   : > { %v242_v21 = vcombine.high %v240_v16, %v240_v16  ;;  %v249_v22 = vrot.slane %v240_v16, %v211_v12 }
  0x64   : > { %v219_v23 = vrot.slane %v205_v17, %v211_v12  ;;  %v220_v24 = vcombine.high %v212_v18, %v212_v18  ;;  %v227_v25 = vsel %vm226_vm1, %v212_v18, 0.0  ;;  %v292_v26 = vrot.slane %v278_v19, %v211_v12 }
  0x65   : > { %v293_v27 = vcombine.high %v285_v20, %v285_v20  ;;  %v299_v28 = vsel %vm226_vm1, %v285_v20, 0.0  ;;  %v256_v29 = vrot.slane %v242_v21, %v211_v12  ;;  %v257_v30 = vcombine.high %v249_v22, %v249_v22 }
  0x66   : > { %v221_v31 = vcombine.high %v219_v23, %v219_v23  ;;  %v228_v32 = vsel %vm226_vm1, %v220_v24, 0.0  ;;  %v230_v33 = vsel %vm226_vm1, %v219_v23, 0.0  ;;  %v294_v34 = vcombine.high %v292_v26, %v292_v26 }
  0x67   : > { %v229_v35 = vadd.f32 %v228_v32, %v227_v25  ;;  %v300_v36 = vsel %vm226_vm1, %v293_v27, 0.0  ;;  %v302_v37 = vsel %vm226_vm1, %v292_v26, 0.0  ;;  %v258_v38 = vcombine.high %v256_v29, %v256_v29 }
  0x68   : > { %v232_v39 = vsel %vm226_vm1, %v221_v31, 0.0  ;;  %v301_v40 = vadd.f32 %v300_v36, %v299_v28  ;;  %v263_v41 = vsel %vm226_vm1, %v249_v22, 0.0  ;;  %v304_v43 = vsel %vm226_vm1, %v294_v34, 0.0 }
  0x69   : > { %v231_v42 = vadd.f32 %v230_v33, %v229_v35  ;;  %v264_v44 = vsel %vm226_vm1, %v257_v30, 0.0  ;;  %v266_v45 = vsel %vm226_vm1, %v256_v29, 0.0  ;;  %v268_v49 = vsel %vm226_vm1, %v258_v38, 0.0 }
  0x6a   : > { %v303_v46 = vadd.f32 %v302_v37, %v301_v40  ;;  %v265_v47 = vadd.f32 %v264_v44, %v263_v41 }
  0x6b   : > { %v233_v48 = vadd.f32 %v232_v39, %v231_v42 }
  0x6c   : > { %v305_v50 = vadd.f32 %v304_v43, %v303_v46  ;;  %v267_v51 = vadd.f32 %v266_v45, %v265_v47 }
  0x6d   : > { %234 = vadd.xlane.f32.xlu0 %v233_v48 }
  0x6e   : > { %306 = vadd.xlane.f32.xlu1 %v305_v50  ;;  %v269_v52 = vadd.f32 %v268_v49, %v267_v51 }
  0x71   : > { %270 = vadd.xlane.f32.xlu0 %v269_v52 }
  0xfa   : > { %v235_v55 = vpop.xlane.xlu0 %234 }
  0xfb   : > { %v236_v56 = vadd.f32 %v235_v55, %v202_v53  ;;  %v307_v57 = vpop.xlane.xlu1 %306  ;;  %313 = sbr.rel (%p427_p8) target bundleno = 300 (0x12c), region = 44 }
  0xfc   : > { %v308_v58 = vadd.f32 %v307_v57, %v274_v54 }
  0xfd   : > { %238 = vst.msk [vmem:[#allocation2] sm:$0x3] %vm237_vm2, %v236_v56 }
  0xfe   : > { %309 = vst.msk [vmem:[#allocation4] sm:$0x3] %vm237_vm2, %v308_v58  ;;  %v271_v60 = vpop.xlane.xlu0 %270 }
  0xff   : > { %v272_v61 = vadd.f32 %v271_v60, %v239_v59 }
 0x101   : > { %273 = vst.msk [vmem:[#allocation3] sm:$0x3] %vm237_vm2, %v272_v61 }
 0x104   : > { %v314_v2 = vld [vmem:[#allocation2] sm:$0x3] }
 0x105   : > { %v316_v63 = vld [vmem:[#allocation4] sm:$0x3]  ;;  %v318_v3 = vmul.f32 2.0, %v314_v2 }
 0x107   : > { %v319_v4 = vadd.f32 1e-05, %v318_v3 }
 0x108   : > { %v315_v62 = vld [vmem:[#allocation3] sm:$0x3] }
 0x109   : > { %v317_v0 = vadd.f32 %v316_v63, %v315_v62 }
 0x10b   : > { %v320_v1 = vadd.f32 1e-05, %v317_v0 }
 0x10d   : > { %487 = vrcp.f32 %v320_v1 }
 0x117   : > { %v488_v5 = vpop.eup %487 }
 0x118   : > { %v322_v6 = vmul.f32 %v488_v5, %v319_v4 }
 0x11a   : > { %v323_v7 = vsub.f32 1.0, %v322_v6 }
 0x11c   : > { %v324_v8 = vsel %vm237_vm2, %v323_v7, 0.0 }
 0x11d   : > { %v325_v9 = vrot.slane %v324_v8, 4 }
 0x11f   : > { %v326_v10 = vadd.f32 %v325_v9, %v324_v8 }
 0x121   : > { %v327_v11 = vrot.slane %v326_v10, 2 }
 0x123   : > { %v328_v12 = vadd.f32 %v327_v11, %v326_v10 }
 0x125   : > { %v329_v13 = vrot.slane %v328_v12, 1 }
 0x127   : > { %v330_v14 = vadd.f32 %v329_v13, %v328_v12 }
 0x129   : > { %v331_v15 = vmul.f32 0.5, %v330_v14 }
 0x12b   : > { %333 = vst.msk [vmem:[#allocation10] sm:$0x1] %vm332_vm3, %v331_v15 }
 0x12c PF: > { %p450_p5 = scmp.eq.s32.totalorder %s658_s13, 1  ;;  %s623_s18 = smov [#allocation10]  }
 0x12d   : > { %s341_s27 = sshll.u32 %s623_s18, 4  ;;  %s342_s27 = int_to_ptr.vmem [resolvable:$true] %s341_s27 }
 0x12e   : > { %s549_s16 = scalar_lea.vmem %s342_s27, 16  ;;  %s555_s25 = scalar_lea.vmem %s342_s27, 32 }
 0x12f   : > { %p550_p1 = scmp.ne.s32.totalorder %s342_s27, %s549_s16  ;;  %p556_p0 = scmp.lt.s32.totalorder %s342_s27, %s342_s27 }
 0x130   : > { %p557_p4 = scmp.lt.s32.totalorder %s555_s25, %s549_s16 }
 0x131   : > { %p551_p2 = pnand %p550_p1, %p450_p5 }
 0x132   : > { %p558_p9 = por %p557_p4, %p556_p0 }
 0x133   : > { %p552_p3 = pneg %p551_p2 }
 0x135   : > { %p559_p10 = pnand %p558_p9, %p552_p3 }
 0x137   : > { %562 = shalt.err (!%p559_p10)
}
 0x138   : > { %s563_s24 = scalar_lea.hbm %s831_s2, 16 }
 0x139   : > { %p564_p11 = scmp.ne.s32.totalorder %s831_s2, %s563_s24  ;;  %p569_p12 = scmp.lt.u32.totalorder %s563_s24, %s831_s2 }
 0x13b   : > { %p565_p13 = pnand %p564_p11, %p450_p5 }
 0x13d   : > { %p566_p6 = pneg %p565_p13 }
 0x13f   : > { %p571_p7 = pnand %p569_p12, %p566_p6 }
 0x141   : > { %574 = shalt.err (!%p571_p7)
}
 0x142   : > { %439 = dma.vmem_to_hbm [thread:$0]  (%p450_p5), %s342_s27, 16, %s831_s2, [#allocation7]  }
 0x143   : > { %600 = dma.done.wait (%p450_p5), [#allocation7], 16  }
 0x144   : > { %602 = vsyncadd (%p450_p5), [#allocation7], 4294967280 }
 0x145 PF: > { %p16_p8 = scmp.ge.s32.totalorder %s661_s14, 4   ;;  %s840_s9 = smov %s609_s10 }
 0x146   : > { %s841_s10 = smov %s613_s11  ;;  %s842_s11 = smov %s671_s17 }
 0x147   : > { %s843_s12 = smov %s661_s14  ;;  %18 = sbr.rel (!%p16_p8) target bundleno = 6 (0x6), region = 86 }
 0x14e   :  { %354 = vsyncpa [#allocation6], 1 }
 0x14f   :  { %356 = vsyncpa [#allocation6 + $0x1], 1 }
 0x150   :  { %357 = vsyncpa [#allocation9], 1 }
 0x151   :  { %359 = vsyncpa [#allocation9 + $0x1], 1 }
 0x152   :  { %360 = vsyncpa [#allocation7], 1 }
 0x153   :  { %362 = vsyncpa [#allocation7 + $0x1], 1 }

</bundles_post_ra>
